<compile_context>
chip_gen: v7x
topology: tpu7x:2x2x1
jax: 0.10.0
libtpu: 0.0.40
codegen_flags: <defaults>
</compile_context>

<pallas_src>
import jax
import jax.numpy as jnp
from jax.experimental import pallas as pl
from jax.experimental.pallas import tpu as pltpu


def _round_up(x, m):
    return ((x + m - 1) // m) * m


# ----------------------------------------------------------------------------
# Fused kernel: grid axis = layer index.
#   layer l:  h <- relu(A_norm @ (h @ W_l) + b_l)
# A_norm / X block indices are constant -> loaded once, VMEM resident.
# Hidden state ping-pongs through a VMEM scratch buffer (bf16).
# ----------------------------------------------------------------------------
def gcn_fused_kernel(a_ref, x_ref, w_ref, b_ref, o_ref, h_ref):
    l = pl.program_id(0)
    last = pl.num_programs(0) - 1

    @pl.when(l == 0)
    def _():
        h_ref[...] = x_ref[...]

    h = h_ref[...]                                        # (Np, Fp) bf16
    # Weight-first then aggregate (== aggregate-then-weight for norm='both').
    xw = jnp.dot(h, w_ref[0], preferred_element_type=jnp.float32)
    agg = jnp.dot(a_ref[...], xw.astype(jnp.bfloat16),
                  preferred_element_type=jnp.float32)
    act = jnp.maximum(agg + b_ref[0], 0.0)                # bias + ReLU (f32)

    @pl.when(l != last)
    def _():
        h_ref[...] = act.astype(h_ref.dtype)

    @pl.when(l == last)
    def _():
        o_ref[...] = act.astype(o_ref.dtype)


# ----------------------------------------------------------------------------
# Wrapper: pad to lane-dense shapes, run the fused kernel, slice back.
# ----------------------------------------------------------------------------
def gcn_forward(a_norm, feat, params):
    """Fused multi-layer GCN forward.

    a_norm: [N, N] normalized adjacency (dst, src).
    feat:   [N, F_in] node features.
    params: list of (W [f_in, f_out], b [1, f_out]) per layer.
    """
    n = a_norm.shape[0]
    f_in = feat.shape[1]
    num_layers = len(params)
    out_dim = params[-1][0].shape[1]

    all_dims = [f_in] + [w.shape[1] for w, _ in params]
    fp = _round_up(max(all_dims), 128)    # padded feature width (lane-dense)
    np_ = _round_up(n, 128)               # padded node count

    a_pad = jnp.zeros((np_, np_), jnp.bfloat16).at[:n, :n].set(
        a_norm.astype(jnp.bfloat16))
    x_pad = jnp.zeros((np_, fp), jnp.bfloat16).at[:n, :f_in].set(
        feat.astype(jnp.bfloat16))
    w_stack = jnp.zeros((num_layers, fp, fp), jnp.bfloat16)
    b_stack = jnp.zeros((num_layers, 1, fp), jnp.float32)
    for i, (w, b) in enumerate(params):
        w_stack = w_stack.at[i, : w.shape[0], : w.shape[1]].set(
            w.astype(jnp.bfloat16))
        b_stack = b_stack.at[i, :, : b.shape[1]].set(b.astype(jnp.float32))

    # VMEM budget: resident A + X + double-buffered (W_l, b_l) + resident
    # output + hidden scratch, with 2x headroom for compiler temporaries.
    vmem_bytes = (np_ * np_ * 2 + np_ * fp * 2
                  + 2 * (fp * fp * 2 + fp * 4)
                  + np_ * fp * 4 + np_ * fp * 2)
    vmem_limit = int(min(128 * 1024 * 1024,
                         max(32 * 1024 * 1024, 2 * vmem_bytes)))

    out_pad = pl.pallas_call(
        gcn_fused_kernel,
        out_shape=jax.ShapeDtypeStruct((np_, fp), jnp.float32),
        grid_spec=pltpu.PrefetchScalarGridSpec(
            num_scalar_prefetch=0,
            grid=(num_layers,),
            in_specs=[
                pl.BlockSpec((np_, np_), lambda l: (0, 0)),      # A_norm (resident)
                pl.BlockSpec((np_, fp), lambda l: (0, 0)),       # X      (resident)
                pl.BlockSpec((1, fp, fp), lambda l: (l, 0, 0)),  # W_l
                pl.BlockSpec((1, 1, fp), lambda l: (l, 0, 0)),   # b_l
            ],
            out_specs=pl.BlockSpec((np_, fp), lambda l: (0, 0)),
            scratch_shapes=[pltpu.VMEM((np_, fp), jnp.bfloat16)],
        ),
        compiler_params=pltpu.CompilerParams(
            dimension_semantics=("arbitrary",),
            vmem_limit_bytes=vmem_limit,
        ),
    )(a_pad, x_pad, w_stack, b_stack)

    return out_pad[:n, :out_dim]


# ----------------------------------------------------------------------------
# GCN module glue: params init, normalized adjacency, pure-JAX reference.
# ----------------------------------------------------------------------------
def init_gcn_params(key, in_dim, out_dim, num_layers=2):
    assert num_layers >= 2
    dims = [in_dim] + [out_dim * 2] * (num_layers - 1) + [out_dim]
    params = []
    for i in range(num_layers):
        key, wk = jax.random.split(key)
        fan_in, fan_out = dims[i], dims[i + 1]
        limit = (6.0 / (fan_in + fan_out)) ** 0.5
        w = jax.random.uniform(wk, (fan_in, fan_out), jnp.float32, -limit, limit)
        b = jnp.zeros((1, fan_out), jnp.float32)
        params.append((w, b))
    return params


def normalized_adjacency(adj):
    """adj[dst, src] = 1.0 for edge src->dst.  norm='both', degs clamped to 1."""
    out_deg = jnp.maximum(adj.sum(axis=0), 1.0)  # per src node
    in_deg = jnp.maximum(adj.sum(axis=1), 1.0)   # per dst node
    norm_src = out_deg ** -0.5
    norm_dst = in_deg ** -0.5
    return norm_dst[:, None] * adj * norm_src[None, :]


def gcn_reference(a_norm, feat, params):
    h = feat
    for w, b in params:
        h = jnp.maximum(a_norm @ (h @ w) + b, 0.0)
    return h


if __name__ == "__main__":
    key = jax.random.PRNGKey(0)
    k_adj, k_feat, k_params = jax.random.split(key, 3)

    N = 16        # number of graph nodes
    IN_DIM = 8
    OUT_DIM = 4
    NUM_LAYERS = 2

    # Random directed graph (dense adjacency; adj[dst, src]).
    adj = (jax.random.uniform(k_adj, (N, N)) < 0.3).astype(jnp.float32)
    a_norm = normalized_adjacency(adj)

    feat = jax.random.normal(k_feat, (N, IN_DIM), jnp.float32)
    params = init_gcn_params(k_params, IN_DIM, OUT_DIM, NUM_LAYERS)

    fwd = jax.jit(gcn_forward)
    out = fwd(a_norm, feat, params)
    out = jax.block_until_ready(out)

    # Correctness check against a pure-JAX f32 reference (bf16 inputs in the
    # kernel -> loosened tolerance).
    ref = gcn_reference(a_norm, feat, params)
    assert out.shape == (N, OUT_DIM)
    assert jnp.allclose(out, ref, rtol=5e-2, atol=5e-2), "mismatch vs reference"

    print("KERNEL_OK")
</pallas_src>

<mosaic_0001>
module attributes {stable_mosaic.version = 11 : i64} {
  func.func @gcn_fused_kernel(%arg0: i32, %arg1: memref<128x128xbf16, #tpu.memory_space<vmem>>, %arg2: memref<128x128xbf16, #tpu.memory_space<vmem>>, %arg3: memref<1x128x128xbf16, #tpu.memory_space<vmem>>, %arg4: memref<1x1x128xf32, #tpu.memory_space<vmem>>, %arg5: memref<128x128xf32, #tpu.memory_space<vmem>>, %arg6: memref<128x128xbf16, #tpu.memory_space<vmem>>) attributes {dimension_semantics = [#tpu.dimension_semantics<arbitrary>], iteration_bounds = array<i64: 2>, scalar_prefetch = 0 : i64, scratch_operands = 1 : i64, tpu.core_type = #tpu.core_type<tc>, window_params = [{pipeline_mode = #tpu.pipeline_mode<synchronous>, transform_indices = @transform_0, window_bounds = array<i64: 128, 128>}, {pipeline_mode = #tpu.pipeline_mode<synchronous>, transform_indices = @transform_1, window_bounds = array<i64: 128, 128>}, {transform_indices = @transform_2, window_bounds = array<i64: 1, 128, 128>}, {transform_indices = @transform_3, window_bounds = array<i64: 1, 1, 128>}, {pipeline_mode = #tpu.pipeline_mode<synchronous>, transform_indices = @transform_4, window_bounds = array<i64: 128, 128>}]} {
    %c0_i32 = arith.constant 0 : i32
    %0 = arith.cmpi eq, %arg0, %c0_i32 : i32
    %1 = arith.extui %0 : i1 to i32
    %c0_i32_0 = arith.constant 0 : i32
    %2 = arith.cmpi ne, %1, %c0_i32_0 : i32
    scf.if %2 {
      %c0_15 = arith.constant 0 : index
      %c0_16 = arith.constant 0 : index
      %22 = vector.load %arg2[%c0_15, %c0_16] : memref<128x128xbf16, #tpu.memory_space<vmem>>, vector<128x128xbf16>
      %c0_17 = arith.constant 0 : index
      %c0_18 = arith.constant 0 : index
      %23 = vector.load %arg6[%c0_17, %c0_18] : memref<128x128xbf16, #tpu.memory_space<vmem>>, vector<128x128xbf16>
      tpu.vector_store %arg6[%c0_17, %c0_18], %22 {strides = array<i32>} : memref<128x128xbf16, #tpu.memory_space<vmem>>, vector<128x128xbf16>,
    } else {
    }
    %c0 = arith.constant 0 : index
    %c0_1 = arith.constant 0 : index
    %3 = vector.load %arg6[%c0, %c0_1] : memref<128x128xbf16, #tpu.memory_space<vmem>>, vector<128x128xbf16>
    %c0_2 = arith.constant 0 : index
    %c0_3 = arith.constant 0 : index
    %c0_4 = arith.constant 0 : index
    %4 = vector.load %arg3[%c0_2, %c0_3, %c0_4] : memref<1x128x128xbf16, #tpu.memory_space<vmem>>, vector<1x128x128xbf16>
    %5 = vector.shape_cast %4 : vector<1x128x128xbf16> to vector<128x128xbf16>
    %cst = arith.constant dense<0.000000e+00> : vector<128x128xf32>
    %6 = tpu.matmul %3, %5, %cst {dimension_numbers = #tpu.dot_dimension_numbers<[1], [0], [0], [1], [0, 0, 1, 1], [], []>} : vector<128x128xbf16>, vector<128x128xbf16>, vector<128x128xf32> -> vector<128x128xf32>
    %c0_5 = arith.constant 0 : index
    %c0_6 = arith.constant 0 : index
    %7 = vector.load %arg1[%c0_5, %c0_6] : memref<128x128xbf16, #tpu.memory_space<vmem>>, vector<128x128xbf16>
    %8 = arith.truncf %6 : vector<128x128xf32> to vector<128x128xbf16>
    %cst_7 = arith.constant dense<0.000000e+00> : vector<128x128xf32>
    %9 = tpu.matmul %7, %8, %cst_7 {dimension_numbers = #tpu.dot_dimension_numbers<[1], [0], [0], [1], [0, 0, 1, 1], [], []>} : vector<128x128xbf16>, vector<128x128xbf16>, vector<128x128xf32> -> vector<128x128xf32>
    %c0_8 = arith.constant 0 : index
    %c0_9 = arith.constant 0 : index
    %c0_10 = arith.constant 0 : index
    %10 = vector.load %arg4[%c0_8, %c0_9, %c0_10] : memref<1x1x128xf32, #tpu.memory_space<vmem>>, vector<1x1x128xf32>
    %11 = vector.shape_cast %10 : vector<1x1x128xf32> to vector<1x128xf32>
    %12 = vector.broadcast %11 : vector<1x128xf32> to vector<128x128xf32>
    %13 = arith.addf %9, %12 : vector<128x128xf32>
    %cst_11 = arith.constant 0.000000e+00 : f32
    %14 = vector.broadcast %cst_11 : f32 to vector<128x128xf32>
    %15 = arith.maximumf %13, %14 : vector<128x128xf32>
    %c1_i32 = arith.constant 1 : i32
    %16 = arith.cmpi ne, %arg0, %c1_i32 : i32
    %17 = arith.extui %16 : i1 to i32
    %c0_i32_12 = arith.constant 0 : i32
    %18 = arith.cmpi ne, %17, %c0_i32_12 : i32
    scf.if %18 {
      %22 = arith.truncf %15 : vector<128x128xf32> to vector<128x128xbf16>
      %c0_15 = arith.constant 0 : index
      %c0_16 = arith.constant 0 : index
      %23 = vector.load %arg6[%c0_15, %c0_16] : memref<128x128xbf16, #tpu.memory_space<vmem>>, vector<128x128xbf16>
      tpu.vector_store %arg6[%c0_15, %c0_16], %22 {strides = array<i32>} : memref<128x128xbf16, #tpu.memory_space<vmem>>, vector<128x128xbf16>,
    } else {
    }
    %c1_i32_13 = arith.constant 1 : i32
    %19 = arith.cmpi eq, %arg0, %c1_i32_13 : i32
    %20 = arith.extui %19 : i1 to i32
    %c0_i32_14 = arith.constant 0 : i32
    %21 = arith.cmpi ne, %20, %c0_i32_14 : i32
    scf.if %21 {
      %c0_15 = arith.constant 0 : index
      %c0_16 = arith.constant 0 : index
      %22 = vector.load %arg5[%c0_15, %c0_16] : memref<128x128xf32, #tpu.memory_space<vmem>>, vector<128x128xf32>
      tpu.vector_store %arg5[%c0_15, %c0_16], %15 {strides = array<i32>} : memref<128x128xf32, #tpu.memory_space<vmem>>, vector<128x128xf32>,
    } else {
    }
    return
  }
  func.func @transform_0(%arg0: i32) -> (i32, i32) {
    %c0_i32 = arith.constant 0 : i32
    %c0_i32_0 = arith.constant 0 : i32
    %c0_i32_1 = arith.constant 0 : i32
    return %c0_i32, %c0_i32_0 : i32, i32
  }
  func.func @transform_1(%arg0: i32) -> (i32, i32) {
    %c0_i32 = arith.constant 0 : i32
    %c0_i32_0 = arith.constant 0 : i32
    %c0_i32_1 = arith.constant 0 : i32
    return %c0_i32, %c0_i32_0 : i32, i32
  }
  func.func @transform_2(%arg0: i32) -> (i32, i32, i32) {
    %c0_i32 = arith.constant 0 : i32
    %c0_i32_0 = arith.constant 0 : i32
    %c0_i32_1 = arith.constant 0 : i32
    return %arg0, %c0_i32, %c0_i32_0 : i32, i32, i32
  }
  func.func @transform_3(%arg0: i32) -> (i32, i32, i32) {
    %c0_i32 = arith.constant 0 : i32
    %c0_i32_0 = arith.constant 0 : i32
    %c0_i32_1 = arith.constant 0 : i32
    return %arg0, %c0_i32, %c0_i32_0 : i32, i32, i32
  }
  func.func @transform_4(%arg0: i32) -> (i32, i32) {
    %c0_i32 = arith.constant 0 : i32
    %c0_i32_0 = arith.constant 0 : i32
    %c0_i32_1 = arith.constant 0 : i32
    return %c0_i32, %c0_i32_0 : i32, i32
  }
}

</mosaic_0001>

<bundles_post_ra>
// kernel: gcn_forward.1
= control target key start
LH: loop header
LB: loop body
LE: loop exit
PB: predicated region body
PF: predicated region fallthrough
CT: control target
= control target key end

     0   :  { %s910_s15 = smov 0   ;;  %s1062_s0 = inlined_call_operand.vmem [shape: bf16[128,128], index: 0, kind: input, shape index: {}]   ;;  %s1063_s1 = inlined_call_operand.vmem [shape: bf16[128,128], index: 1, kind: input, shape index: {}]   ;;  %s1064_s2 = inlined_call_operand.vmem [shape: bf16[2,128,128], index: 2, kind: input, shape index: {}]   ;;  %s1065_s3 = inlined_call_operand.vmem [shape: f32[2,1,128], index: 3, kind: input, shape index: {}]   ;;  %s1066_s4 = inlined_call_operand.vmem [shape: f32[128,128], index: 4, kind: output, shape index: {}]  }
   0x1 LB: > { %s916_s16 = sadd.s32 4294967295, %s883_s15   ;;  %p715_p0 = scmp.ge.s32.totalorder %s883_s15, 1  ;;  %s883_s15 = sphi %s910_s15, %s14_s15  }
   0x2   : > { %p165_p1 = scmp.lt.s32.totalorder %s883_s15, 3 }
   0x4   : > { %p166_p2 = pnand %p715_p0, %p165_p1 }
   0x5   : > { %p189_p3 = scmp.lt.s32.totalorder (!%p166_p2), %s916_s16, 1  ;;  %p718_p4 = scmp.ne.s32.totalorder (!%p166_p2), %s916_s16, 0 }
   0x6   : > { %169 = sbr.rel (%p166_p2) target bundleno = 558 (0x22e), region = 36 }
   0xd   : > { %s922_s17 = scalar_select %p189_p3, %s916_s16, 1 }
   0xe   : > { %201 = sbr.rel (%p718_p4) target bundleno = 21 (0x15), region = 40  ;;  %v853_v0 = vld [vmem:[%s1063_s1] sm:$0xff] (!%p718_p4)   ;;  %v854_v1 = vld [vmem:[%s1063_s1 + $0x8] sm:$0xff] (!%p718_p4)   ;;  %v855_v2 = vld [vmem:[%s1063_s1 + $0x10] sm:$0xff] (!%p718_p4)  }
   0xf   : > { %s748_s18 = sshll.u32 %s922_s17, 6  ;;  %s196_s21 = scalar_lea.vmem %s1065_s3, %s922_s17  ;;  %266 = vst [vmem:[#allocation2] sm:$0xff] (!%p718_p4), %v853_v0  ;;  %267 = vst [vmem:[#allocation2 + $0x8] sm:$0xff] (!%p718_p4), %v854_v1  ;;  %v856_v3 = vld [vmem:[%s1063_s1 + $0x18] sm:$0xff] (!%p718_p4)   ;;  %v857_v4 = vld [vmem:[%s1063_s1 + $0x20] sm:$0xff] (!%p718_p4)  }
  0x10   : > { %s932_s24 = scalar_lea.vmem %s1064_s2, %s748_s18  ;;  %268 = vst [vmem:[#allocation2 + $0x10] sm:$0xff] (!%p718_p4), %v855_v2  ;;  %269 = vst [vmem:[#allocation2 + $0x18] sm:$0xff] (!%p718_p4), %v856_v3  ;;  %v858_v5 = vld [vmem:[%s1063_s1 + $0x28] sm:$0xff] (!%p718_p4)   ;;  %v859_v6 = vld [vmem:[%s1063_s1 + $0x30] sm:$0xff] (!%p718_p4)  }
  0x11   : > { %270 = vst [vmem:[#allocation2 + $0x20] sm:$0xff] (!%p718_p4), %v857_v4  ;;  %271 = vst [vmem:[#allocation2 + $0x28] sm:$0xff] (!%p718_p4), %v858_v5  ;;  %v860_v7 = vld [vmem:[%s1063_s1 + $0x38] sm:$0xff] (!%p718_p4)  }
  0x12   : > { %272 = vst [vmem:[#allocation2 + $0x30] sm:$0xff] (!%p718_p4), %v859_v6  ;;  %273 = vst [vmem:[#allocation2 + $0x38] sm:$0xff] (!%p718_p4), %v860_v7 }
  0x15 PF: > { %v861_v8 = vld [vmem:[%s932_s24] sm:$0xff]   ;;  %v862_v9 = vld [vmem:[%s932_s24 + $0x8] sm:$0xff]   ;;  %v863_v10 = vld [vmem:[%s932_s24 + $0x10] sm:$0xff]   ;;  %p744_p5 = scmp.eq.s32.totalorder %s916_s16, 1 }
  0x16   : > { %781 = vmatprep.subr.bf16.mxu0 %v861_v8  ;;  %v864_v11 = vld [vmem:[%s932_s24 + $0x18] sm:$0xff]   ;;  %v274_v12 = vld [vmem:[#allocation2] sm:$0xff]  ;;  %v866_v14 = vld [vmem:[%s932_s24 + $0x28] sm:$0xff]  }
  0x17   : > { %782 = vmatpush3.bf16.msra.mxu0 %v861_v8  ;;  %797 = vmatprep.mubr.bf16.mxu0 %v274_v12  ;;  %v865_v13 = vld [vmem:[%s932_s24 + $0x20] sm:$0xff]   ;;  %v867_v15 = vld [vmem:[%s932_s24 + $0x30] sm:$0xff]   ;;  %v868_v16 = vld [vmem:[%s932_s24 + $0x38] sm:$0xff]  }
  0x18   : > { %783 = vmatprep.subr.bf16.mxu0 %v862_v9  ;;  %v275_v17 = vld [vmem:[#allocation2 + $0x8] sm:$0xff]  ;;  %v276_v18 = vld [vmem:[#allocation2 + $0x10] sm:$0xff]  ;;  %v277_v19 = vld [vmem:[#allocation2 + $0x18] sm:$0xff] }
  0x19   : > { %v278_v20 = vld [vmem:[#allocation2 + $0x20] sm:$0xff]  ;;  %v279_v21 = vld [vmem:[#allocation2 + $0x28] sm:$0xff]  ;;  %v280_v22 = vld [vmem:[#allocation2 + $0x30] sm:$0xff] }
  0x1a   : > { %v281_v23 = vld [vmem:[#allocation2 + $0x38] sm:$0xff]  ;;  %v869_v24 = vld [vmem:[%s1062_s0] sm:$0xff]   ;;  %v870_v49 = vld [vmem:[%s1062_s0 + $0x8] sm:$0xff]  }
  0x1b   : > { %784 = vmatpush3.bf16.msra.mxu0 %v862_v9  ;;  %829 = vmatprep.mubr.bf16.mxu1 %v869_v24  ;;  %v871_v50 = vld [vmem:[%s1062_s0 + $0x10] sm:$0xff]   ;;  %v872_v51 = vld [vmem:[%s1062_s0 + $0x18] sm:$0xff]   ;;  %v873_v52 = vld [vmem:[%s1062_s0 + $0x20] sm:$0xff]  }
  0x1c   : > { %785 = vmatprep.subr.bf16.mxu0 %v863_v10  ;;  %v874_v53 = vld [vmem:[%s1062_s0 + $0x28] sm:$0xff]   ;;  %v875_v54 = vld [vmem:[%s1062_s0 + $0x30] sm:$0xff]   ;;  %v876_v55 = vld [vmem:[%s1062_s0 + $0x38] sm:$0xff]  }
  0x1d   : > { %v735_v56 = vld [vmem:[%s196_s21] ss:$0 sm:$0xff] }
  0x1f   : > { %786 = vmatpush3.bf16.msra.mxu0 %v863_v10 }
  0x20   : > { %787 = vmatprep.subr.bf16.mxu0 %v864_v11 }
  0x23   : > { %788 = vmatpush3.bf16.msra.mxu0 %v864_v11 }
  0x24   : > { %789 = vmatprep.subr.bf16.mxu0 %v865_v13 }
  0x27   : > { %790 = vmatpush3.bf16.msra.mxu0 %v865_v13 }
  0x28   : > { %791 = vmatprep.subr.bf16.mxu0 %v866_v14 }
  0x2b   : > { %792 = vmatpush3.bf16.msra.mxu0 %v866_v14 }
  0x2c   : > { %793 = vmatprep.subr.bf16.mxu0 %v867_v15 }
  0x2f   : > { %794 = vmatpush3.bf16.msra.mxu0 %v867_v15 }
  0x30   : > { %795 = vmatprep.subr.bf16.mxu0 %v868_v16 }
  0x33   : > { %796 = vmatpush3.bf16.msra.mxu0 %v868_v16 }
  0x36   : > { %798 = vmatmul.mubr.bf16.vlgmr.msra.gmra.mrb[0].mxu0 %v275_v17 }
  0x37   : > { %801 = vmatprep.mubr.bf16.mxu0 %v276_v18 }
  0x3e   : > { %802 = vmatmul.mubr.bf16.gmra.mrb[4].mxu0 %v277_v19 }
  0x3f   : > { %805 = vmatprep.mubr.bf16.mxu0 %v278_v20 }
  0x46   : > { %806 = vmatmul.mubr.bf16.gmra.mrb[8].mxu0 %v279_v21 }
  0x47   : > { %809 = vmatprep.mubr.bf16.mxu0 %v280_v22 }
  0x4e   : > { %810 = vmatmul.mubr.bf16.gmra.mrb[12].mxu0 %v281_v23 }
 0x109   : > { %v799_v25 = vpop.f32.mrb[0].mxu0 }
 0x10a   : > { %v380_v26 = vpop.f32.mrb[1].mxu0 }
 0x10b   : > { %v800_v27 = vpop.f32.mrb[2].mxu0 }
 0x10c   : > { %v460_v28 = vpack.c.bf16 %v800_v27, %v799_v25  ;;  %v383_v29 = vpop.f32.mrb[3].mxu0 }
 0x10d   : > { %v459_v30 = vpack.c.bf16 %v383_v29, %v380_v26 }
 0x10f   : > { %813 = vmatprep.subr.bf16.mxu1 %v459_v30 }
 0x110   : > { %814 = vmatpush3.bf16.msra.mxu1 %v459_v30 }
 0x111   : > { %v803_v31 = vpop.f32.mrb[4].mxu0  ;;  %815 = vmatprep.subr.bf16.mxu1 %v460_v28 }
 0x112   : > { %v396_v32 = vpop.f32.mrb[5].mxu0 }
 0x113   : > { %v804_v33 = vpop.f32.mrb[6].mxu0 }
 0x114   : > { %v462_v34 = vpack.c.bf16 %v804_v33, %v803_v31  ;;  %v399_v35 = vpop.f32.mrb[7].mxu0  ;;  %816 = vmatpush3.bf16.msra.mxu1 %v460_v28 }
 0x115   : > { %v461_v36 = vpack.c.bf16 %v399_v35, %v396_v32 }
 0x117   : > { %817 = vmatprep.subr.bf16.mxu1 %v461_v36 }
 0x118   : > { %818 = vmatpush3.bf16.msra.mxu1 %v461_v36 }
 0x119   : > { %v807_v37 = vpop.f32.mrb[8].mxu0  ;;  %819 = vmatprep.subr.bf16.mxu1 %v462_v34 }
 0x11a   : > { %v412_v38 = vpop.f32.mrb[9].mxu0 }
 0x11b   : > { %v808_v39 = vpop.f32.mrb[10].mxu0 }
 0x11c   : > { %v464_v40 = vpack.c.bf16 %v808_v39, %v807_v37  ;;  %v415_v41 = vpop.f32.mrb[11].mxu0  ;;  %820 = vmatpush3.bf16.msra.mxu1 %v462_v34 }
 0x11d   : > { %v463_v42 = vpack.c.bf16 %v415_v41, %v412_v38 }
 0x11f   : > { %821 = vmatprep.subr.bf16.mxu1 %v463_v42 }
 0x120   : > { %822 = vmatpush3.bf16.msra.mxu1 %v463_v42 }
 0x121   : > { %v811_v43 = vpop.f32.mrb[12].mxu0  ;;  %823 = vmatprep.subr.bf16.mxu1 %v464_v40 }
 0x122   : > { %v428_v44 = vpop.f32.mrb[13].mxu0 }
 0x123   : > { %v812_v45 = vpop.f32.mrb[14].mxu0 }
 0x124   : > { %v466_v46 = vpack.c.bf16 %v812_v45, %v811_v43  ;;  %v431_v47 = vpop.f32.mrb[15].mxu0  ;;  %824 = vmatpush3.bf16.msra.mxu1 %v464_v40 }
 0x125   : > { %v465_v48 = vpack.c.bf16 %v431_v47, %v428_v44 }
 0x127   : > { %825 = vmatprep.subr.bf16.mxu1 %v465_v48 }
 0x128   : > { %826 = vmatpush3.bf16.msra.mxu1 %v465_v48 }
 0x129   : > { %827 = vmatprep.subr.bf16.mxu1 %v466_v46 }
 0x12c   : > { %828 = vmatpush3.bf16.msra.mxu1 %v466_v46 }
 0x12f   : > { %830 = vmatmul.mubr.bf16.vlgmr.msra.gmra.mrb[0].mxu1 %v870_v49 }
 0x130   : > { %833 = vmatprep.mubr.bf16.mxu1 %v871_v50 }
 0x137   : > { %834 = vmatmul.mubr.bf16.gmra.mrb[4].mxu1 %v872_v51 }
 0x138   : > { %837 = vmatprep.mubr.bf16.mxu1 %v873_v52 }
 0x13f   : > { %838 = vmatmul.mubr.bf16.gmra.mrb[8].mxu1 %v874_v53 }
 0x140   : > { %841 = vmatprep.mubr.bf16.mxu1 %v875_v54 }
 0x147   : > { %842 = vmatmul.mubr.bf16.gmra.mrb[12].mxu1 %v876_v55 }
 0x202   : > { %v831_v57 = vpop.f32.mrb[0].mxu1 }
 0x203   : > { %v996_v58 = vadd.f32 %v831_v57, %v735_v56  ;;  %v556_v59 = vpop.f32.mrb[1].mxu1 }
 0x204   : > { %v998_v60 = vadd.f32 %v735_v56, %v556_v59  ;;  %v832_v61 = vpop.f32.mrb[2].mxu1 }
 0x205   : > { %v621_v62 = vmax.f32 %v996_v58, 0.0  ;;  %v1001_v63 = vadd.f32 %v832_v61, %v735_v56  ;;  %v559_v0 = vpop.f32.mrb[3].mxu1 }
 0x206   : > { %v619_v1 = vmax.f32 %v998_v60, 0.0  ;;  %v560_v2 = vadd.f32 %v735_v56, %v559_v0 }
 0x207   : > { %v622_v3 = vmax.f32 %v1001_v63, 0.0 }
 0x208   : > { %v620_v4 = vmax.f32 %v560_v2, 0.0 }
 0x209   : > { %v640_v42 = vpack.c.bf16 (!%p744_p5), %v622_v3, %v621_v62 }
 0x20a   : > { %v835_v5 = vpop.f32.mrb[4].mxu1  ;;  %v639_v41 = vpack.c.bf16 (!%p744_p5), %v620_v4, %v619_v1 }
 0x20b   : > { %v581_v6 = vadd.f32 %v835_v5, %v735_v56  ;;  %v572_v7 = vpop.f32.mrb[5].mxu1  ;;  %648 = vst [vmem:[#allocation2 + $0x8] sm:$0xff] (!%p744_p5), %v640_v42 }
 0x20c   : > { %v573_v8 = vadd.f32 %v735_v56, %v572_v7  ;;  %v836_v9 = vpop.f32.mrb[6].mxu1  ;;  %647 = vst [vmem:[#allocation2] sm:$0xff] (!%p744_p5), %v639_v41 }
 0x20d   : > { %v625_v10 = vmax.f32 %v581_v6, 0.0  ;;  %v584_v11 = vadd.f32 %v836_v9, %v735_v56  ;;  %v575_v12 = vpop.f32.mrb[7].mxu1 }
 0x20e   : > { %v623_v13 = vmax.f32 %v573_v8, 0.0  ;;  %v576_v14 = vadd.f32 %v735_v56, %v575_v12 }
 0x20f   : > { %v626_v15 = vmax.f32 %v584_v11, 0.0 }
 0x210   : > { %v624_v16 = vmax.f32 %v576_v14, 0.0 }
 0x211   : > { %v642_v44 = vpack.c.bf16 (!%p744_p5), %v626_v15, %v625_v10 }
 0x212   : > { %v839_v17 = vpop.f32.mrb[8].mxu1  ;;  %v641_v43 = vpack.c.bf16 (!%p744_p5), %v624_v16, %v623_v13 }
 0x213   : > { %v597_v18 = vadd.f32 %v839_v17, %v735_v56  ;;  %v588_v19 = vpop.f32.mrb[9].mxu1  ;;  %650 = vst [vmem:[#allocation2 + $0x18] sm:$0xff] (!%p744_p5), %v642_v44 }
 0x214   : > { %v589_v20 = vadd.f32 %v735_v56, %v588_v19  ;;  %v840_v21 = vpop.f32.mrb[10].mxu1  ;;  %649 = vst [vmem:[#allocation2 + $0x10] sm:$0xff] (!%p744_p5), %v641_v43 }
 0x215   : > { %v629_v22 = vmax.f32 %v597_v18, 0.0  ;;  %v600_v23 = vadd.f32 %v840_v21, %v735_v56  ;;  %v591_v24 = vpop.f32.mrb[11].mxu1 }
 0x216   : > { %v627_v25 = vmax.f32 %v589_v20, 0.0  ;;  %v592_v26 = vadd.f32 %v735_v56, %v591_v24 }
 0x217   : > { %v630_v27 = vmax.f32 %v600_v23, 0.0 }
 0x218   : > { %v628_v28 = vmax.f32 %v592_v26, 0.0 }
 0x219   : > { %v644_v46 = vpack.c.bf16 (!%p744_p5), %v630_v27, %v629_v22 }
 0x21a   : > { %v843_v29 = vpop.f32.mrb[12].mxu1  ;;  %638 = sbr.rel (%p744_p5) target bundleno = 549 (0x225), region = 44  ;;  %v643_v45 = vpack.c.bf16 (!%p744_p5), %v628_v28, %v627_v25 }
 0x21b   : > { %v613_v30 = vadd.f32 %v843_v29, %v735_v56  ;;  %v604_v31 = vpop.f32.mrb[13].mxu1  ;;  %652 = vst [vmem:[#allocation2 + $0x28] sm:$0xff] (!%p744_p5), %v644_v46 }
 0x21c   : > { %v605_v32 = vadd.f32 %v735_v56, %v604_v31  ;;  %v844_v33 = vpop.f32.mrb[14].mxu1  ;;  %651 = vst [vmem:[#allocation2 + $0x20] sm:$0xff] (!%p744_p5), %v643_v45 }
 0x21d   : > { %v633_v34 = vmax.f32 %v613_v30, 0.0  ;;  %v616_v35 = vadd.f32 %v844_v33, %v735_v56  ;;  %v607_v36 = vpop.f32.mrb[15].mxu1 }
 0x21e   : > { %v631_v37 = vmax.f32 %v605_v32, 0.0  ;;  %v608_v38 = vadd.f32 %v735_v56, %v607_v36 }
 0x21f   : > { %v634_v39 = vmax.f32 %v616_v35, 0.0 }
 0x220   : > { %v632_v40 = vmax.f32 %v608_v38, 0.0 }
 0x221   : > { %v646_v48 = vpack.c.bf16 %v634_v39, %v633_v34 }
 0x222   : > { %v645_v47 = vpack.c.bf16 %v632_v40, %v631_v37 }
 0x223   : > { %654 = vst [vmem:[#allocation2 + $0x38] sm:$0xff] %v646_v48 }
 0x224   : > { %653 = vst [vmem:[#allocation2 + $0x30] sm:$0xff] %v645_v47 }
 0x225 PF: > { %p745_p6 = scmp.ne.s32.totalorder %s916_s16, 1 }
 0x226   : > { %659 = vst [vmem:[%s1066_s4] sm:$0xff] (!%p745_p6), %v619_v1  ;;  %660 = vst [vmem:[%s1066_s4 + $0x8] sm:$0xff] (!%p745_p6), %v620_v4 }
 0x227   : > { %658 = sbr.rel (%p745_p6) target bundleno = 558 (0x22e), region = 48  ;;  %661 = vst [vmem:[%s1066_s4 + $0x10] sm:$0xff] (!%p745_p6), %v621_v62  ;;  %662 = vst [vmem:[%s1066_s4 + $0x18] sm:$0xff] (!%p745_p6), %v622_v3 }
 0x228   : > { %663 = vst [vmem:[%s1066_s4 + $0x20] sm:$0xff] (!%p745_p6), %v623_v13  ;;  %664 = vst [vmem:[%s1066_s4 + $0x28] sm:$0xff] (!%p745_p6), %v624_v16 }
 0x229   : > { %665 = vst [vmem:[%s1066_s4 + $0x30] sm:$0xff] (!%p745_p6), %v625_v10  ;;  %666 = vst [vmem:[%s1066_s4 + $0x38] sm:$0xff] (!%p745_p6), %v626_v15 }
 0x22a   : > { %667 = vst [vmem:[%s1066_s4 + $0x40] sm:$0xff] (!%p745_p6), %v627_v25  ;;  %668 = vst [vmem:[%s1066_s4 + $0x48] sm:$0xff] (!%p745_p6), %v628_v28 }
 0x22b   : > { %669 = vst [vmem:[%s1066_s4 + $0x50] sm:$0xff] (!%p745_p6), %v629_v22  ;;  %670 = vst [vmem:[%s1066_s4 + $0x58] sm:$0xff] (!%p745_p6), %v630_v27 }
 0x22c   : > { %671 = vst [vmem:[%s1066_s4 + $0x60] sm:$0xff] (!%p745_p6), %v631_v37  ;;  %672 = vst [vmem:[%s1066_s4 + $0x68] sm:$0xff] (!%p745_p6), %v632_v40 }
 0x22d   : > { %673 = vst [vmem:[%s1066_s4 + $0x70] sm:$0xff] (!%p745_p6), %v633_v34  ;;  %674 = vst [vmem:[%s1066_s4 + $0x78] sm:$0xff] (!%p745_p6), %v634_v39 }
 0x22e PF: > { %s14_s15 = sadd.s32 1, %s883_s15  }
 0x22f   : > { %p11_p7 = scmp.ge.s32.totalorder %s14_s15, 4  }
 0x231   :  { %13 = sbr.rel (!%p11_p7) target bundleno = 1 (0x1), region = 77 }

</bundles_post_ra>
